<compile_context>
chip_gen: v7x
topology: tpu7x:2x2x1
jax: 0.10.0
libtpu: 0.0.40
codegen_flags: <defaults>
</compile_context>

<pallas_src>
import numpy as np
import jax
import jax.numpy as jnp
from jax.experimental import pallas as pl
from jax.experimental.pallas import tpu as pltpu


def loreft_kernel(base_ref, m_ref, rt_ref, b_ref, out_ref):
    x = base_ref[...]                                   # (tm, D), native dtype

    # low = x @ (W^T - R) + b    -- single D-contraction MXU pass, f32 accum.
    low = jnp.dot(x, m_ref[...], preferred_element_type=jnp.float32)   # (tm, r)
    low = low + b_ref[...]                                              # f32 bias

    # delta = low @ R^T          -- R^T pre-transposed on host (no XLU work).
    delta = jnp.dot(low.astype(rt_ref.dtype), rt_ref[...],
                    preferred_element_type=jnp.float32)                 # (tm, D)

    # Residual add in f32, cast once to the output dtype.
    out_ref[...] = (x.astype(jnp.float32) + delta).astype(out_ref.dtype)


def _round_up(a, m):
    return ((a + m - 1) // m) * m


def loreft_intervention(base, R, W, b, *, tm=512,
                        vmem_limit_bytes=48 * 1024 * 1024):
    """LoReFT(h) = h + ((h W^T + b) - h R) R^T, applied over the last axis.

    base: (..., D).  R: (D, r) orthonormal columns.  W: (r, D).  b: (r,).
    tm: row tile (multiple of 8; ideally a multiple of 128/256).
    """
    orig_shape = base.shape
    D = orig_shape[-1]
    r = R.shape[1]
    N = int(np.prod(orig_shape[:-1]))
    x = base.reshape(N, D)

    dt = base.dtype
    # Fused / pre-transposed weights (exact algebra; done once on host).
    M = (W.T.astype(jnp.float32) - R.astype(jnp.float32)).astype(dt)   # (D, r)
    Rt = jnp.transpose(R).astype(dt)                                    # (r, D)
    b2 = b.reshape(1, r).astype(jnp.float32)                            # (1, r)

    # Clip the tile to the (8-aligned) token count and pad rows so any B*S works.
    tm_eff = min(tm, _round_up(N, 8))
    n_pad = _round_up(N, tm_eff)
    if n_pad != N:
        x = jnp.pad(x, ((0, n_pad - N), (0, 0)))

    out = pl.pallas_call(
        loreft_kernel,
        out_shape=jax.ShapeDtypeStruct((n_pad, D), dt),
        grid_spec=pltpu.PrefetchScalarGridSpec(
            num_scalar_prefetch=0,
            grid=(n_pad // tm_eff,),
            in_specs=[
                pl.BlockSpec((tm_eff, D), lambda i: (i, 0)),   # token rows
                pl.BlockSpec((D, r), lambda i: (0, 0)),        # M = W^T - R
                pl.BlockSpec((r, D), lambda i: (0, 0)),        # R^T
                pl.BlockSpec((1, r), lambda i: (0, 0)),        # bias
            ],
            out_specs=pl.BlockSpec((tm_eff, D), lambda i: (i, 0)),
        ),
        compiler_params=pltpu.CompilerParams(
            dimension_semantics=("parallel",),
            vmem_limit_bytes=vmem_limit_bytes),
    )(x, M, Rt, b2)

    return out[:N].reshape(orig_shape)


def loreft_reference(base, R, W, b):
    rotated = base @ R
    source = base @ W.T + b
    return base + (source - rotated) @ R.T


if __name__ == "__main__":
    key = jax.random.PRNGKey(0)
    B, S, D, r = 2, 8, 32, 4   # batch, seq, embed_dim, low_rank_dimension

    k_base, k_rot, k_w, k_b = jax.random.split(key, 4)

    # base hidden states
    base = jax.random.normal(k_base, (B, S, D), dtype=jnp.float32)

    # Deterministic orthogonal init for the rotate layer (columns orthonormal).
    A = jax.random.normal(k_rot, (D, r), dtype=jnp.float32)
    R, _ = jnp.linalg.qr(A)                    # (D, r), R^T R = I_r

    # learned_source: Linear(D -> r), PyTorch-style uniform init bounds.
    bound = 1.0 / np.sqrt(D)
    W = jax.random.uniform(k_w, (r, D), minval=-bound, maxval=bound,
                           dtype=jnp.float32)
    b = jax.random.uniform(k_b, (r,), minval=-bound, maxval=bound,
                           dtype=jnp.float32)

    out = loreft_intervention(base, R, W, b)
    out = jax.block_until_ready(out)

    ref = loreft_reference(base, R, W, b)
    # Fusion (W^T - R) changes f32 summation order slightly -> modest tolerance.
    np.testing.assert_allclose(np.asarray(out), np.asarray(ref),
                               rtol=1e-4, atol=1e-5)
    print("KERNEL_OK")
</pallas_src>

<mosaic_0001>
module attributes {stable_mosaic.version = 11 : i64} {
  func.func @loreft_kernel(%arg0: i32, %arg1: memref<16x32xf32, #tpu.memory_space<vmem>>, %arg2: memref<32x4xf32, #tpu.memory_space<vmem>>, %arg3: memref<4x32xf32, #tpu.memory_space<vmem>>, %arg4: memref<1x4xf32, #tpu.memory_space<vmem>>, %arg5: memref<16x32xf32, #tpu.memory_space<vmem>>) attributes {dimension_semantics = [#tpu.dimension_semantics<parallel>], iteration_bounds = array<i64: 1>, scalar_prefetch = 0 : i64, scratch_operands = 0 : i64, tpu.core_type = #tpu.core_type<tc>, window_params = [{transform_indices = @transform_0, window_bounds = array<i64: 16, 32>}, {pipeline_mode = #tpu.pipeline_mode<synchronous>, transform_indices = @transform_1, window_bounds = array<i64: 32, 4>}, {pipeline_mode = #tpu.pipeline_mode<synchronous>, transform_indices = @transform_2, window_bounds = array<i64: 4, 32>}, {pipeline_mode = #tpu.pipeline_mode<synchronous>, transform_indices = @transform_3, window_bounds = array<i64: 1, 4>}, {transform_indices = @transform_4, window_bounds = array<i64: 16, 32>}]} {
    %c0 = arith.constant 0 : index
    %c0_0 = arith.constant 0 : index
    %0 = vector.load %arg1[%c0, %c0_0] : memref<16x32xf32, #tpu.memory_space<vmem>>, vector<16x32xf32>
    %c0_1 = arith.constant 0 : index
    %c0_2 = arith.constant 0 : index
    %1 = vector.load %arg2[%c0_1, %c0_2] : memref<32x4xf32, #tpu.memory_space<vmem>>, vector<32x4xf32>
    %cst = arith.constant dense<0.000000e+00> : vector<16x4xf32>
    %2 = tpu.matmul %0, %1, %cst {dimension_numbers = #tpu.dot_dimension_numbers<[1], [0], [0], [1], [0, 0, 1, 1], [], []>} : vector<16x32xf32>, vector<32x4xf32>, vector<16x4xf32> -> vector<16x4xf32>
    %c0_3 = arith.constant 0 : index
    %c0_4 = arith.constant 0 : index
    %3 = vector.load %arg4[%c0_3, %c0_4] : memref<1x4xf32, #tpu.memory_space<vmem>>, vector<1x4xf32>
    %4 = vector.broadcast %3 : vector<1x4xf32> to vector<16x4xf32>
    %5 = arith.addf %2, %4 : vector<16x4xf32>
    %c0_5 = arith.constant 0 : index
    %c0_6 = arith.constant 0 : index
    %6 = vector.load %arg3[%c0_5, %c0_6] : memref<4x32xf32, #tpu.memory_space<vmem>>, vector<4x32xf32>
    %cst_7 = arith.constant dense<0.000000e+00> : vector<16x32xf32>
    %7 = tpu.matmul %5, %6, %cst_7 {dimension_numbers = #tpu.dot_dimension_numbers<[1], [0], [0], [1], [0, 0, 1, 1], [], []>} : vector<16x4xf32>, vector<4x32xf32>, vector<16x32xf32> -> vector<16x32xf32>
    %8 = arith.addf %0, %7 : vector<16x32xf32>
    %c0_8 = arith.constant 0 : index
    %c0_9 = arith.constant 0 : index
    %9 = vector.load %arg5[%c0_8, %c0_9] : memref<16x32xf32, #tpu.memory_space<vmem>>, vector<16x32xf32>
    tpu.vector_store %arg5[%c0_8, %c0_9], %8 {strides = array<i32>} : memref<16x32xf32, #tpu.memory_space<vmem>>, vector<16x32xf32>,
    return
  }
  func.func @transform_0(%arg0: i32) -> (i32, i32) {
    %c0_i32 = arith.constant 0 : i32
    %c0_i32_0 = arith.constant 0 : i32
    return %arg0, %c0_i32 : i32, i32
  }
  func.func @transform_1(%arg0: i32) -> (i32, i32) {
    %c0_i32 = arith.constant 0 : i32
    %c0_i32_0 = arith.constant 0 : i32
    %c0_i32_1 = arith.constant 0 : i32
    return %c0_i32, %c0_i32_0 : i32, i32
  }
  func.func @transform_2(%arg0: i32) -> (i32, i32) {
    %c0_i32 = arith.constant 0 : i32
    %c0_i32_0 = arith.constant 0 : i32
    %c0_i32_1 = arith.constant 0 : i32
    return %c0_i32, %c0_i32_0 : i32, i32
  }
  func.func @transform_3(%arg0: i32) -> (i32, i32) {
    %c0_i32 = arith.constant 0 : i32
    %c0_i32_0 = arith.constant 0 : i32
    %c0_i32_1 = arith.constant 0 : i32
    return %c0_i32, %c0_i32_0 : i32, i32
  }
  func.func @transform_4(%arg0: i32) -> (i32, i32) {
    %c0_i32 = arith.constant 0 : i32
    %c0_i32_0 = arith.constant 0 : i32
    return %arg0, %c0_i32 : i32, i32
  }
}

</mosaic_0001>

<bundles_post_ra>
// kernel: tpu_custom_call.1
= control target key start
LH: loop header
LB: loop body
LE: loop exit
PB: predicated region body
PF: predicated region fallthrough
CT: control target
= control target key end

     0   :  { %vm31_vm0 = vcmask 261120   ;;  %s354_s0 = inlined_call_operand.vmem [shape: f32[16,32], index: 0, kind: input, shape index: {}]   ;;  %s355_s1 = inlined_call_operand.vmem [shape: f32[32,4], index: 1, kind: input, shape index: {}]   ;;  %s356_s2 = inlined_call_operand.vmem [shape: f32[4,32], index: 2, kind: input, shape index: {}]   ;;  %s357_s3 = inlined_call_operand.vmem [shape: f32[1,4], index: 3, kind: input, shape index: {}]   ;;  %s358_s4 = inlined_call_operand.hbm [shape: f32[16,32], index: 4, kind: output, shape index: {}]  }
   0x1   :  { %v20_v0 = vld [vmem:[%s355_s1] sm:$0xff]  ;;  %v21_v1 = vld [vmem:[%s355_s1 + $0x8] sm:$0xff]  ;;  %v22_v2 = vld [vmem:[%s355_s1 + $0x10] sm:$0xff] }
   0x2   :  { %v251_v3 = vpack.c.bf16 %v21_v1, %v20_v0  ;;  %v23_v4 = vld [vmem:[%s355_s1 + $0x18] sm:$0xff]  ;;  %v18_v5 = vld [vmem:[%s354_s0] sm:$0xff] }
   0x3   :  { %v255_v6 = vpack.c.bf16 %v23_v4, %v22_v2  ;;  %243 = vmatprep.mubr.msk.f32.mxu0 %vm31_vm0, %v18_v5 }
   0x4   :  { %9 = vsyncpa [#allocation3], 0  ;;  %252 = vmatprep.subr.bf16.mxu0 %v251_v3  ;;  %v19_v7 = vld [vmem:[%s354_s0 + $0x8] sm:$0xff]  ;;  %v113_v8 = vld [vmem:[%s356_s2] sm:$0xf]  ;;  %vm121_vm1 = vcmask 1043456  }
   0x5   :  { %254 = vmatpush3.bf16.msra.mxu0 %v251_v3  ;;  %246 = vmatprep.subr.msk.mxu1 %vm121_vm1, %v113_v8  ;;  %v220_v9 = vld [vmem:[%s357_s3] ss:$0 sm:$0xff]  ;;  %vm114_vm2 = vcmask 31744   ;;  %s286_s0 = smov [#allocation2]  }
   0x6   :  { %256 = vmatprep.subr.bf16.mxu0 %v255_v6  ;;  %247 = vmatpush3.msk.msra.mxu1 %vm121_vm1, %v113_v8  ;;  %s209_s30 = sshll.u32 %s286_s0, 4  ;;  %s210_s30 = int_to_ptr.vmem [resolvable:$true] %s209_s30 }
   0x7   :  { %s262_s2 = scalar_lea.vmem %s210_s30, 256  ;;  %p267_p1 = scmp.lt.s32.totalorder %s210_s30, %s210_s30 }
   0x8   :  { %p263_p0 = scmp.ne.s32.totalorder %s210_s30, %s262_s2  ;;  %p268_p2 = scmp.lt.s32.totalorder %s262_s2, %s262_s2 }
   0x9   :  { %258 = vmatpush3.bf16.msra.mxu0 %v255_v6 }
   0xa   :  { %p269_p3 = por %p268_p2, %p267_p1 }
   0xc   :  { %244 = vmatmul.mubr.msk.f32.vlgmr.msra.gmra.mrb[0].mxu0 %vm31_vm0, %v19_v7  ;;  %p270_p4 = pnand %p269_p3, %p263_p0 }
  0xdf   :  { %v245_v10 = vpop.f32.mrb[0].mxu0 }
  0xe0   :  { %v104_v11 = vpop.f32.mrb[1].mxu0  ;;  %v110_v13 = vadd.f32 %v245_v10, %v220_v9 }
  0xe1   :  { %v105_v12 = vadd.f32 %v220_v9, %v104_v11 }
  0xe3   :  { %248 = vmatprep.mubr.msk.f32.mxu1 %vm114_vm2, %v105_v12 }
  0xe4   :  { %249 = vmatmul.mubr.msk.f32.vlgmr.msra.gmra.mrb[0].mxu1 %vm114_vm2, %v110_v13 }
 0x1b7   :  { %v250_v14 = vpop.f32.mrb[0].mxu1 }
 0x1b8   :  { %v201_v15 = vadd.f32 %v250_v14, %v19_v7  ;;  %v191_v16 = vpop.f32.mrb[1].mxu1 }
 0x1b9   :  { %v200_v17 = vadd.f32 %v191_v16, %v18_v5 }
 0x1ba   :  { %203 = vst.msk [vmem:[#allocation2 + $0x8] sm:$0xff] %vm31_vm0, %v201_v15 }
 0x1bb   :  { %202 = vst.msk [vmem:[#allocation2] sm:$0xff] %vm31_vm0, %v200_v17 }
 0x1bc   :  { %273 = shalt.err (!%p270_p4)
}
 0x1bd   :  { %s274_s6 = scalar_lea.hbm %s358_s4, 256 }
 0x1be   :  { %p275_p5 = scmp.ne.s32.totalorder %s358_s4, %s274_s6  ;;  %p278_p6 = scmp.lt.u32.totalorder %s274_s6, %s358_s4 }
 0x1c0   :  { %p280_p7 = pnand %p278_p6, %p275_p5 }
 0x1c2   :  { %283 = shalt.err (!%p280_p7)
}
 0x1c3   :  { %s287_s11 = smov 128   ;;  %s288_s12 = smov 8  }
 0x1c4   :  { %215 = dma.vmem_to_hbm [thread:$0]  %s210_s30, 256, %s358_s4, [#allocation3], %s287_s11, %s287_s11, %s288_s12  }
 0x1c5   :  { %284 = dma.done.wait [#allocation3], 256  }
 0x1c6   :  { %285 = vsyncadd [#allocation3], 4294967040 }
 0x1c7   :  { %219 = vsyncpa [#allocation3], 1 }

</bundles_post_ra>
